<compile_context>
chip_gen: v7x
topology: tpu7x:2x2x1
jax: 0.10.0
libtpu: 0.0.40
codegen_flags: <defaults>
</compile_context>

<pallas_src>
import numpy as np
import jax
import jax.numpy as jnp
from jax import lax
from jax.experimental import pallas as pl
from jax.experimental.pallas import tpu as pltpu


def _spectral_conv1d_kernel(xt_ref, wT_ref, b_ref, wu_ref, wv_ref,
                            f2_ref, finv_ref, o_ref):
    Bt, Cin, S = xt_ref.shape
    M2 = f2_ref.shape[0]          # 2 * modes
    M = M2 // 2
    Cout = wT_ref.shape[0]

    xt = xt_ref[...]                                       # (Bt, Cin, S)
    x2 = xt.reshape(Bt * Cin, S)                           # merge leading dims

    # ---- forward truncated rDFT: one MXU matmul, K = S ----------------------
    # rows of f2: [cos_0..cos_{M-1}, -sin_0..-sin_{M-1}] / sqrt(S)
    xhat = lax.dot_general(f2_ref[...], x2, (((1,), (1,)), ((), ())),
                           preferred_element_type=jnp.float32)   # (2M, Bt*Cin)
    xhat = xhat.reshape(M2, Bt, Cin).astype(wu_ref.dtype)  # small relayout, rows [Re; Im]

    # ---- per-mode complex channel mix: two mode-batched MXU matmuls ---------
    dn = (((2,), (1,)), ((0,), (0,)))                      # contract Cin, batch modes
    d1 = lax.dot_general(xhat, wu_ref[...], dn,
                         preferred_element_type=jnp.float32)     # [xr.wr ; xi.wr]
    d2 = lax.dot_general(xhat, wv_ref[...], dn,
                         preferred_element_type=jnp.float32)     # [xr.wi ; -xi.wi]
    # swap re/im halves of d2 (leading-axis shuffle, cheap) and add:
    #   rows [Re out ; Im out] = [xr.wr - xi.wi ; xi.wr + xr.wi]
    out_stk = d1 + jnp.concatenate([d2[M:], d2[:M]], axis=0)     # (2M, Bt, Cout)

    # ---- inverse truncated rDFT: one MXU matmul, K = 2M ---------------------
    out2 = out_stk.astype(finv_ref.dtype).reshape(M2, Bt * Cout)
    y = lax.dot_general(out2, finv_ref[...], (((0,), (0,)), ((), ())),
                        preferred_element_type=jnp.float32)      # (Bt*Cout, S)
    y = y.reshape(Bt, Cout, S)                                   # leading-dim split

    # ---- linear residual: one Bt-batched dot_general, cols = S --------------
    wT_b = jnp.broadcast_to(wT_ref[...][None], (Bt, Cout, Cin))  # hoisted, small
    res = lax.dot_general(wT_b, xt, (((2,), (1,)), ((0,), (0,))),
                          preferred_element_type=jnp.float32)    # (Bt, Cout, S)

    # ---- bias + SiLU, lane-dense (Bt, Cout, S) store ------------------------
    bias = b_ref[...][None]                                      # (1, Cout, 1)
    z = y + res + bias
    o_ref[...] = (z * jax.nn.sigmoid(z)).astype(o_ref.dtype)


def _dft_bases(S, M, dtype):
    n = np.arange(S, dtype=np.float64)
    k = np.arange(M, dtype=np.float64)
    ang = 2.0 * np.pi * np.outer(k, n) / S                       # (M, S)
    scale = 1.0 / np.sqrt(S)
    fwd = np.concatenate([np.cos(ang), -np.sin(ang)], axis=0) * scale          # (2M, S)
    # irfft: DC (and Nyquist, if present) counted once, other bins twice.
    wk = np.where((k == 0) | ((S % 2 == 0) & (k == S // 2)), 1.0, 2.0)
    inv = np.concatenate([np.cos(ang) * wk[:, None],
                          -np.sin(ang) * wk[:, None]], axis=0) * scale         # (2M, S)
    return (jnp.asarray(fwd.astype(np.float32), dtype=dtype),
            jnp.asarray(inv.astype(np.float32), dtype=dtype))


def _tpu_vmem_info():
    """(physical VMEM bytes per core, is dual-TensorCore chip). Robust fallbacks."""
    dual = False
    try:
        kind = jax.devices()[0].device_kind.lower()
        dual = ("v7" in kind) or ("7x" in kind)
    except Exception:
        pass
    try:
        vmem = int(pltpu.get_tpu_info().vmem_capacity_bytes)
    except Exception:
        vmem = (64 << 20) if dual else (128 << 20)
    return vmem, dual


def _pick_block_batch(B, S, Cin, Cout, M, *, itemsize, out_itemsize,
                      vmem_budget_bytes, dual_core):
    """Largest batch tile fitting the VMEM budget (>=2 grid steps only on dual-TC)."""
    # constant operands (double-buffered by the pipeline): f2, finv, wu, wv, wT, bias
    const_bytes = 2 * itemsize * (2 * (2 * M * S)
                                  + 2 * (2 * M * Cin * Cout)
                                  + Cout * Cin + Cout)
    # streaming tiles (double-buffered): x tile in, out tile out
    per_b_io = 2 * (itemsize * Cin * S + out_itemsize * Cout * S)
    # f32 live intermediates per batch row (y, res, z slabs + small spectral temps)
    per_b_live = 4 * (3 * Cout * S + 2 * M * (2 * Cin + 4 * Cout))
    headroom = 2 << 20
    avail = vmem_budget_bytes - const_bytes - headroom
    per_b = max(per_b_io + per_b_live, 1)
    bt = max(1, int(avail // per_b))
    bt = min(bt, B)
    if dual_core and B >= 2:
        bt = min(bt, max(1, B // 2))        # keep >=2 grid steps so both TCs get work
    return max(1, int(bt))


def spectral_conv1d(x, w_lin, b_lin, fourier_weight, modes, *, param_dtype=jnp.float32):
    """x: (B, S, Cin) f32; w_lin: (Cin, Cout) (== torch Linear.weight.T);
    b_lin: (Cout,); fourier_weight: (Cin, Cout, modes, 2).  Returns (B, S, Cout) f32.
    param_dtype=jnp.bfloat16 runs the DFT bases / weights on the MXU in bf16 with f32
    accumulation (worthwhile on v6e/v7x, but validate accuracy per shape)."""
    # TODO(synk): nn.Dropout is implemented as eval-mode identity (no RNG mask).
    B, S, Cin = x.shape
    Cout = w_lin.shape[1]
    M = int(modes)
    assert 1 <= M <= S // 2 + 1

    f2, finv = _dft_bases(S, M, param_dtype)                               # (2M,S) each

    wT = jnp.asarray(w_lin, jnp.float32).T.astype(param_dtype)             # (Cout, Cin)
    bias = jnp.asarray(b_lin, jnp.float32).reshape(Cout, 1)                # f32
    fw = jnp.asarray(fourier_weight, jnp.float32)
    wr = jnp.transpose(fw[..., 0], (2, 0, 1))                              # (M, Cin, Cout)
    wi = jnp.transpose(fw[..., 1], (2, 0, 1))
    wu = jnp.concatenate([wr, wr], axis=0).astype(param_dtype)             # multiplies [xr; xi]
    wv = jnp.concatenate([wi, -wi], axis=0).astype(param_dtype)

    # channels-first: the long spatial axis S sits on the 128-lane axis in the kernel.
    xt = jnp.transpose(x, (0, 2, 1)).astype(param_dtype)                   # (B, Cin, S)

    itemsize = jnp.dtype(param_dtype).itemsize
    phys_vmem, dual_core = _tpu_vmem_info()
    budget = (64 << 20) if phys_vmem >= (96 << 20) else int(phys_vmem * 0.65)
    vmem_limit = int(min(phys_vmem, budget + (16 << 20)))

    Bt = _pick_block_batch(B, S, Cin, Cout, M, itemsize=itemsize, out_itemsize=4,
                           vmem_budget_bytes=budget, dual_core=dual_core)
    Bp = ((B + Bt - 1) // Bt) * Bt
    if Bp != B:
        xt = jnp.pad(xt, ((0, Bp - B), (0, 0), (0, 0)))

    out = pl.pallas_call(
        _spectral_conv1d_kernel,
        out_shape=jax.ShapeDtypeStruct((Bp, Cout, S), jnp.float32),
        grid_spec=pltpu.PrefetchScalarGridSpec(
            num_scalar_prefetch=0,
            grid=(Bp // Bt,),
            in_specs=[
                pl.BlockSpec((Bt, Cin, S), lambda b: (b, 0, 0)),        # x (channels-first)
                pl.BlockSpec((Cout, Cin), lambda b: (0, 0)),            # linear weight^T
                pl.BlockSpec((Cout, 1), lambda b: (0, 0)),              # linear bias
                pl.BlockSpec((2 * M, Cin, Cout), lambda b: (0, 0, 0)),  # packed [wr; wr]
                pl.BlockSpec((2 * M, Cin, Cout), lambda b: (0, 0, 0)),  # packed [wi; -wi]
                pl.BlockSpec((2 * M, S), lambda b: (0, 0)),             # forward DFT basis
                pl.BlockSpec((2 * M, S), lambda b: (0, 0)),             # inverse DFT basis
            ],
            out_specs=pl.BlockSpec((Bt, Cout, S), lambda b: (b, 0, 0)),
        ),
        compiler_params=pltpu.CompilerParams(
            dimension_semantics=("parallel",),
            vmem_limit_bytes=vmem_limit,
        ),
    )(xt, wT, bias, wu, wv, f2, finv)

    out = out[:B]                                       # drop batch padding, (B, Cout, S)
    return jnp.transpose(out, (0, 2, 1))                # (B, S, Cout)


def _reference_numpy(x, w_lin, b_lin, fw, modes):
    """Pure numpy reference reproducing the PyTorch forward (eval mode)."""
    B, S, Cin = x.shape
    res = x @ w_lin + b_lin                                   # (B, S, Cout)
    xt = np.transpose(x, (0, 2, 1))                           # (B, Cin, S)
    x_ft = np.fft.rfft(xt, n=S, norm='ortho')[:, :, :modes]
    a_re, a_im = x_ft.real, x_ft.imag
    b_re, b_im = fw[..., 0], fw[..., 1]
    out_re = (np.einsum('bix,iox->box', a_re, b_re)
              - np.einsum('bix,iox->box', a_im, b_im))
    out_im = (np.einsum('bix,iox->box', a_im, b_re)
              + np.einsum('bix,iox->box', a_re, b_im))
    full = np.zeros((B, b_re.shape[1], S // 2 + 1), dtype=np.complex128)
    full[:, :, :modes] = out_re + 1j * out_im
    y = np.fft.irfft(full, n=S, norm='ortho')                 # (B, Cout, S)
    z = np.transpose(y, (0, 2, 1)) + res
    return (z / (1.0 + np.exp(-z))).astype(np.float32)        # SiLU


if __name__ == "__main__":
    B, S, Cin, Cout, M = 2, 16, 4, 4, 5

    key = jax.random.PRNGKey(0)
    k1, k2, k3, k4 = jax.random.split(key, 4)
    x = jax.random.normal(k1, (B, S, Cin), dtype=jnp.float32)
    # nn.Linear(in_dim, out_dim): torch stores weight as (Cout, Cin); we keep (Cin, Cout).
    w_lin = jax.random.normal(k2, (Cin, Cout), dtype=jnp.float32) * (1.0 / np.sqrt(Cin))
    b_lin = jax.random.normal(k3, (Cout,), dtype=jnp.float32) * 0.1
    # fourier_weight shape from __init__: (in_dim, out_dim, modes, 2).
    fourier_weight = jax.random.normal(k4, (Cin, Cout, M, 2), dtype=jnp.float32) * 0.1

    y = spectral_conv1d(x, w_lin, b_lin, fourier_weight, M)
    y = jax.block_until_ready(y)

    y_ref = _reference_numpy(np.asarray(x), np.asarray(w_lin), np.asarray(b_lin),
                             np.asarray(fourier_weight), M)
    assert y.shape == (B, S, Cout)
    max_diff = float(np.max(np.abs(np.asarray(y) - y_ref)))
    assert np.allclose(np.asarray(y), y_ref, atol=1e-3, rtol=1e-3), \
        f"mismatch vs reference, max abs diff = {max_diff}"
    print("KERNEL_OK")
</pallas_src>

<mosaic_0001>
module attributes {stable_mosaic.version = 11 : i64} {
  func.func @_spectral_conv1d_kernel(%arg0: i32, %arg1: memref<2x4x16xf32, #tpu.memory_space<vmem>>, %arg2: memref<4x4xf32, #tpu.memory_space<vmem>>, %arg3: memref<4x1xf32, #tpu.memory_space<vmem>>, %arg4: memref<10x4x4xf32, #tpu.memory_space<vmem>>, %arg5: memref<10x4x4xf32, #tpu.memory_space<vmem>>, %arg6: memref<10x16xf32, #tpu.memory_space<vmem>>, %arg7: memref<10x16xf32, #tpu.memory_space<vmem>>, %arg8: memref<2x4x16xf32, #tpu.memory_space<vmem>>) attributes {dimension_semantics = [#tpu.dimension_semantics<parallel>], iteration_bounds = array<i64: 1>, scalar_prefetch = 0 : i64, scratch_operands = 0 : i64, tpu.core_type = #tpu.core_type<tc>, window_params = [{transform_indices = @transform_0, window_bounds = array<i64: 2, 4, 16>}, {pipeline_mode = #tpu.pipeline_mode<synchronous>, transform_indices = @transform_1, window_bounds = array<i64: 4, 4>}, {pipeline_mode = #tpu.pipeline_mode<synchronous>, transform_indices = @transform_2, window_bounds = array<i64: 4, 1>}, {pipeline_mode = #tpu.pipeline_mode<synchronous>, transform_indices = @transform_3, window_bounds = array<i64: 10, 4, 4>}, {pipeline_mode = #tpu.pipeline_mode<synchronous>, transform_indices = @transform_4, window_bounds = array<i64: 10, 4, 4>}, {pipeline_mode = #tpu.pipeline_mode<synchronous>, transform_indices = @transform_5, window_bounds = array<i64: 10, 16>}, {pipeline_mode = #tpu.pipeline_mode<synchronous>, transform_indices = @transform_6, window_bounds = array<i64: 10, 16>}, {transform_indices = @transform_7, window_bounds = array<i64: 2, 4, 16>}]} {
    %c0 = arith.constant 0 : index
    %c0_0 = arith.constant 0 : index
    %c0_1 = arith.constant 0 : index
    %0 = vector.load %arg1[%c0, %c0_0, %c0_1] : memref<2x4x16xf32, #tpu.memory_space<vmem>>, vector<2x4x16xf32>
    %1 = vector.shape_cast %0 : vector<2x4x16xf32> to vector<8x16xf32>
    %c0_2 = arith.constant 0 : index
    %c0_3 = arith.constant 0 : index
    %2 = vector.load %arg6[%c0_2, %c0_3] : memref<10x16xf32, #tpu.memory_space<vmem>>, vector<10x16xf32>
    %cst = arith.constant dense<0.000000e+00> : vector<10x8xf32>
    %3 = tpu.matmul %2, %1, %cst {dimension_numbers = #tpu.dot_dimension_numbers<[1], [1], [0], [0], [0, 0, 1, 0], [], []>} : vector<10x16xf32>, vector<8x16xf32>, vector<10x8xf32> -> vector<10x8xf32>
    %4 = vector.shape_cast %3 : vector<10x8xf32> to vector<10x2x4xf32>
    %c0_4 = arith.constant 0 : index
    %c0_5 = arith.constant 0 : index
    %c0_6 = arith.constant 0 : index
    %5 = vector.load %arg4[%c0_4, %c0_5, %c0_6] : memref<10x4x4xf32, #tpu.memory_space<vmem>>, vector<10x4x4xf32>
    %cst_7 = arith.constant dense<0.000000e+00> : vector<10x2x4xf32>
    %6 = tpu.matmul %4, %5, %cst_7 {dimension_numbers = #tpu.dot_dimension_numbers<[2], [1], [1], [2], [0, 0, 0, 1, 1, 2], [0], [0]>} : vector<10x2x4xf32>, vector<10x4x4xf32>, vector<10x2x4xf32> -> vector<10x2x4xf32>
    %c0_8 = arith.constant 0 : index
    %c0_9 = arith.constant 0 : index
    %c0_10 = arith.constant 0 : index
    %7 = vector.load %arg5[%c0_8, %c0_9, %c0_10] : memref<10x4x4xf32, #tpu.memory_space<vmem>>, vector<10x4x4xf32>
    %cst_11 = arith.constant dense<0.000000e+00> : vector<10x2x4xf32>
    %8 = tpu.matmul %4, %7, %cst_11 {dimension_numbers = #tpu.dot_dimension_numbers<[2], [1], [1], [2], [0, 0, 0, 1, 1, 2], [0], [0]>} : vector<10x2x4xf32>, vector<10x4x4xf32>, vector<10x2x4xf32> -> vector<10x2x4xf32>
    %9 = vector.extract_strided_slice %8 {offsets = [5, 0, 0], sizes = [5, 2, 4], strides = [1, 1, 1]} : vector<10x2x4xf32> to vector<5x2x4xf32>
    %10 = vector.extract_strided_slice %8 {offsets = [0, 0, 0], sizes = [5, 2, 4], strides = [1, 1, 1]} : vector<10x2x4xf32> to vector<5x2x4xf32>
    %11 = tpu.concatenate %9, %10 in 0 : vector<5x2x4xf32>, vector<5x2x4xf32> -> vector<10x2x4xf32>
    %12 = arith.addf %6, %11 : vector<10x2x4xf32>
    %13 = vector.shape_cast %12 : vector<10x2x4xf32> to vector<10x8xf32>
    %c0_12 = arith.constant 0 : index
    %c0_13 = arith.constant 0 : index
    %14 = vector.load %arg7[%c0_12, %c0_13] : memref<10x16xf32, #tpu.memory_space<vmem>>, vector<10x16xf32>
    %cst_14 = arith.constant dense<0.000000e+00> : vector<8x16xf32>
    %15 = tpu.matmul %13, %14, %cst_14 {dimension_numbers = #tpu.dot_dimension_numbers<[0], [0], [1], [1], [0, 1, 1, 1], [], []>} : vector<10x8xf32>, vector<10x16xf32>, vector<8x16xf32> -> vector<8x16xf32>
    %16 = vector.shape_cast %15 : vector<8x16xf32> to vector<2x4x16xf32>
    %c0_15 = arith.constant 0 : index
    %c0_16 = arith.constant 0 : index
    %17 = vector.load %arg2[%c0_15, %c0_16] : memref<4x4xf32, #tpu.memory_space<vmem>>, vector<4x4xf32>
    %18 = vector.shape_cast %17 : vector<4x4xf32> to vector<1x4x4xf32>
    %19 = vector.shape_cast %18 : vector<1x4x4xf32> to vector<1x4x4xf32>
    %20 = vector.broadcast %19 : vector<1x4x4xf32> to vector<2x4x4xf32>
    %cst_17 = arith.constant dense<0.000000e+00> : vector<2x4x16xf32>
    %21 = tpu.matmul %20, %0, %cst_17 {dimension_numbers = #tpu.dot_dimension_numbers<[2], [1], [1], [2], [0, 0, 0, 1, 1, 2], [0], [0]>} : vector<2x4x4xf32>, vector<2x4x16xf32>, vector<2x4x16xf32> -> vector<2x4x16xf32>
    %c0_18 = arith.constant 0 : index
    %c0_19 = arith.constant 0 : index
    %22 = vector.load %arg3[%c0_18, %c0_19] : memref<4x1xf32, #tpu.memory_space<vmem>>, vector<4x1xf32>
    %23 = vector.shape_cast %22 : vector<4x1xf32> to vector<1x4x1xf32>
    %24 = arith.addf %16, %21 : vector<2x4x16xf32>
    %25 = vector.broadcast %23 : vector<1x4x1xf32> to vector<2x4x16xf32>
    %26 = arith.addf %24, %25 : vector<2x4x16xf32>
    %27 = arith.negf %26 : vector<2x4x16xf32>
    %28 = math.exp %27 : vector<2x4x16xf32>
    %cst_20 = arith.constant 1.000000e+00 : f32
    %29 = vector.broadcast %cst_20 : f32 to vector<2x4x16xf32>
    %30 = arith.addf %29, %28 : vector<2x4x16xf32>
    %31 = arith.divf %29, %30 : vector<2x4x16xf32>
    %32 = arith.mulf %26, %31 : vector<2x4x16xf32>
    %c0_21 = arith.constant 0 : index
    %c0_22 = arith.constant 0 : index
    %c0_23 = arith.constant 0 : index
    %33 = vector.load %arg8[%c0_21, %c0_22, %c0_23] : memref<2x4x16xf32, #tpu.memory_space<vmem>>, vector<2x4x16xf32>
    tpu.vector_store %arg8[%c0_21, %c0_22, %c0_23], %32 {strides = array<i32>} : memref<2x4x16xf32, #tpu.memory_space<vmem>>, vector<2x4x16xf32>,
    return
  }
  func.func @transform_0(%arg0: i32) -> (i32, i32, i32) {
    %c0_i32 = arith.constant 0 : i32
    %c0_i32_0 = arith.constant 0 : i32
    %c0_i32_1 = arith.constant 0 : i32
    return %arg0, %c0_i32, %c0_i32_0 : i32, i32, i32
  }
  func.func @transform_1(%arg0: i32) -> (i32, i32) {
    %c0_i32 = arith.constant 0 : i32
    %c0_i32_0 = arith.constant 0 : i32
    %c0_i32_1 = arith.constant 0 : i32
    return %c0_i32, %c0_i32_0 : i32, i32
  }
  func.func @transform_2(%arg0: i32) -> (i32, i32) {
    %c0_i32 = arith.constant 0 : i32
    %c0_i32_0 = arith.constant 0 : i32
    %c0_i32_1 = arith.constant 0 : i32
    return %c0_i32, %c0_i32_0 : i32, i32
  }
  func.func @transform_3(%arg0: i32) -> (i32, i32, i32) {
    %c0_i32 = arith.constant 0 : i32
    %c0_i32_0 = arith.constant 0 : i32
    %c0_i32_1 = arith.constant 0 : i32
    %c0_i32_2 = arith.constant 0 : i32
    return %c0_i32, %c0_i32_0, %c0_i32_1 : i32, i32, i32
  }
  func.func @transform_4(%arg0: i32) -> (i32, i32, i32) {
    %c0_i32 = arith.constant 0 : i32
    %c0_i32_0 = arith.constant 0 : i32
    %c0_i32_1 = arith.constant 0 : i32
    %c0_i32_2 = arith.constant 0 : i32
    return %c0_i32, %c0_i32_0, %c0_i32_1 : i32, i32, i32
  }
  func.func @transform_5(%arg0: i32) -> (i32, i32) {
    %c0_i32 = arith.constant 0 : i32
    %c0_i32_0 = arith.constant 0 : i32
    %c0_i32_1 = arith.constant 0 : i32
    return %c0_i32, %c0_i32_0 : i32, i32
  }
  func.func @transform_6(%arg0: i32) -> (i32, i32) {
    %c0_i32 = arith.constant 0 : i32
    %c0_i32_0 = arith.constant 0 : i32
    %c0_i32_1 = arith.constant 0 : i32
    return %c0_i32, %c0_i32_0 : i32, i32
  }
  func.func @transform_7(%arg0: i32) -> (i32, i32, i32) {
    %c0_i32 = arith.constant 0 : i32
    %c0_i32_0 = arith.constant 0 : i32
    %c0_i32_1 = arith.constant 0 : i32
    return %arg0, %c0_i32, %c0_i32_0 : i32, i32, i32
  }
}

</mosaic_0001>

<bundles_post_ra>
// kernel: tpu_custom_call.1
= control target key start
LH: loop header
LB: loop body
LE: loop exit
PB: predicated region body
PF: predicated region fallthrough
CT: control target
= control target key end

     0   :  { %12 = vsyncpa [#allocation3], 0  ;;  %s3002_s0 = inlined_call_operand.hbm [shape: f32[2,4,16], index: 0, kind: input, shape index: {}]   ;;  %s3003_s1 = inlined_call_operand.hbm [shape: f32[4,4], index: 1, kind: input, shape index: {}]   ;;  %s3004_s2 = inlined_call_operand.hbm [shape: f32[4,1], index: 2, kind: input, shape index: {}]   ;;  %s3005_s3 = inlined_call_operand.hbm [shape: f32[10,4,4], index: 3, kind: input, shape index: {}]   ;;  %s3006_s4 = inlined_call_operand.hbm [shape: f32[10,4,4], index: 4, kind: input, shape index: {}]   ;;  %s3007_s5 = inlined_call_operand.hbm [shape: f32[10,16], index: 5, kind: input, shape index: {}]   ;;  %s3008_s6 = inlined_call_operand.hbm [shape: f32[10,16], index: 6, kind: input, shape index: {}]   ;;  %s3009_s7 = inlined_call_operand.hbm [shape: f32[2,4,16], index: 7, kind: output, shape index: {}]  }
   0x1   :  { %13 = vsyncpa [#allocation6], 0 }
   0x2   :  { %14 = vsyncpa [#allocation9], 0 }
   0x3   :  { %15 = vsyncpa [#allocation12], 0 }
   0x4   :  { %16 = vsyncpa [#allocation4], 0  ;;  %s2647_s24 = smov [#allocation5]   ;;  %s2461_s28 = scalar_lea.hbm %s3003_s1, 64 }
   0x5   :  { %s35_s25 = sshll.u32 %s2647_s24, 4  ;;  %p2462_p0 = scmp.ne.s32.totalorder %s3003_s1, %s2461_s28  ;;  %s36_s25 = int_to_ptr.vmem [resolvable:$true] %s35_s25 }
   0x6   :  { %p2465_p1 = scmp.lt.u32.totalorder %s2461_s28, %s3003_s1 }
   0x8   :  { %p2467_p2 = pnand %p2465_p1, %p2462_p0 }
   0xa   :  { %2470 = shalt.err (!%p2467_p2)
}
   0xb   :  { %s2471_s10 = scalar_lea.vmem %s36_s25, 64  ;;  %p2476_p4 = scmp.lt.s32.totalorder %s36_s25, %s36_s25 }
   0xc   :  { %p2472_p3 = scmp.ne.s32.totalorder %s36_s25, %s2471_s10  ;;  %p2477_p5 = scmp.lt.s32.totalorder %s2471_s10, %s2471_s10 }
   0xe   :  { %p2478_p6 = por %p2477_p5, %p2476_p4 }
  0x10   :  { %p2479_p7 = pnand %p2478_p6, %p2472_p3 }
  0x12   :  { %2482 = shalt.err (!%p2479_p7)
}
  0x13   :  { %38 = dma.hbm_to_vmem [thread:$0]  %s3003_s1, 64, %s36_s25, [#allocation6]  }
  0x14   :  { %s2648_s13 = smov [#allocation8]   ;;  %s2649_s15 = smov [#allocation11]  }
  0x15   :  { %s54_s14 = sshll.u32 %s2648_s13, 4  ;;  %s78_s16 = sshll.u32 %s2649_s15, 4  ;;  %s55_s14 = int_to_ptr.vmem [resolvable:$true] %s54_s14  ;;  %s79_s16 = int_to_ptr.vmem [resolvable:$true] %s78_s16 }
  0x16   :  { %s2483_s19 = scalar_lea.hbm %s3005_s3, 640 }
  0x17   :  { %p2484_p8 = scmp.ne.s32.totalorder %s3005_s3, %s2483_s19  ;;  %p2487_p9 = scmp.lt.u32.totalorder %s2483_s19, %s3005_s3 }
  0x19   :  { %p2489_p10 = pnand %p2487_p9, %p2484_p8 }
  0x1b   :  { %2492 = shalt.err (!%p2489_p10)
}
  0x1c   :  { %s2493_s1 = scalar_lea.vmem %s55_s14, 640  ;;  %p2498_p12 = scmp.lt.s32.totalorder %s55_s14, %s55_s14 }
  0x1d   :  { %p2494_p11 = scmp.ne.s32.totalorder %s55_s14, %s2493_s1  ;;  %p2499_p13 = scmp.lt.s32.totalorder %s2493_s1, %s2493_s1 }
  0x1f   :  { %p2500_p0 = por %p2499_p13, %p2498_p12 }
  0x21   :  { %p2501_p1 = pnand %p2500_p0, %p2494_p11 }
  0x23   :  { %2504 = shalt.err (!%p2501_p1)
}
  0x24   :  { %s2650_s24 = smov 64   ;;  %s2651_s25 = smov 4  }
  0x25   :  { %60 = dma.hbm_to_vmem [thread:$0]  %s3005_s3, 640, %s55_s14, [#allocation9], %s2650_s24, %s2650_s24, %s2651_s25  }
  0x26   :  { %s2505_s30 = scalar_lea.hbm %s3007_s5, 256 }
  0x27   :  { %p2506_p2 = scmp.ne.s32.totalorder %s3007_s5, %s2505_s30  ;;  %p2509_p3 = scmp.lt.u32.totalorder %s2505_s30, %s3007_s5 }
  0x29   :  { %p2511_p4 = pnand %p2509_p3, %p2506_p2 }
  0x2b   :  { %2514 = shalt.err (!%p2511_p4)
}
  0x2c   :  { %s2515_s12 = scalar_lea.vmem %s79_s16, 256  ;;  %p2520_p6 = scmp.lt.s32.totalorder %s79_s16, %s79_s16 }
  0x2d   :  { %p2516_p5 = scmp.ne.s32.totalorder %s79_s16, %s2515_s12  ;;  %p2521_p7 = scmp.lt.s32.totalorder %s2515_s12, %s2515_s12 }
  0x2f   :  { %p2522_p8 = por %p2521_p7, %p2520_p6 }
  0x31   :  { %p2523_p9 = pnand %p2522_p8, %p2516_p5 }
  0x33   :  { %2526 = shalt.err (!%p2523_p9)
}
  0x34   :  { %s2652_s3 = smov 128   ;;  %s2653_s13 = smov 8  }
  0x35   :  { %84 = dma.hbm_to_vmem [thread:$0]  %s3007_s5, 256, %s79_s16, [#allocation12], %s2652_s3, %s2652_s3, %s2653_s13  }
  0x36   :  { %s2654_s17 = smov [#allocation2]   ;;  %s2655_s19 = smov [#allocation7]  }
  0x37   :  { %s22_s18 = sshll.u32 %s2654_s17, 4  ;;  %s45_s20 = sshll.u32 %s2655_s19, 4  ;;  %s23_s18 = int_to_ptr.vmem [resolvable:$true] %s22_s18  ;;  %s46_s20 = int_to_ptr.vmem [resolvable:$true] %s45_s20 }
  0x38   :  { %s2527_s23 = scalar_lea.hbm %s3002_s0, 128 }
  0x39   :  { %p2528_p10 = scmp.ne.s32.totalorder %s3002_s0, %s2527_s23  ;;  %p2531_p11 = scmp.lt.u32.totalorder %s2527_s23, %s3002_s0 }
  0x3b   :  { %p2533_p12 = pnand %p2531_p11, %p2528_p10 }
  0x3d   :  { %2536 = shalt.err (!%p2533_p12)
}
  0x3e   :  { %s2537_s5 = scalar_lea.vmem %s23_s18, 128  ;;  %p2542_p0 = scmp.lt.s32.totalorder %s23_s18, %s23_s18 }
  0x3f   :  { %p2538_p13 = scmp.ne.s32.totalorder %s23_s18, %s2537_s5  ;;  %p2543_p1 = scmp.lt.s32.totalorder %s2537_s5, %s2537_s5 }
  0x41   :  { %p2544_p2 = por %p2543_p1, %p2542_p0 }
  0x43   :  { %p2545_p3 = pnand %p2544_p2, %p2538_p13 }
  0x45   :  { %2548 = shalt.err (!%p2545_p3)
}
  0x46   :  { %28 = dma.hbm_to_vmem [thread:$0]  %s3002_s0, 128, %s23_s18, [#allocation3], %s2650_s24, %s2650_s24, %s2651_s25  }
  0x47   :  { %s2549_s9 = scalar_lea.hbm %s3004_s2, 64 }
  0x48   :  { %p2550_p4 = scmp.ne.s32.totalorder %s3004_s2, %s2549_s9  ;;  %p2553_p5 = scmp.lt.u32.totalorder %s2549_s9, %s3004_s2 }
  0x4a   :  { %p2555_p6 = pnand %p2553_p5, %p2550_p4 }
  0x4c   :  { %2558 = shalt.err (!%p2555_p6)
}
  0x4d   :  { %s2559_s15 = scalar_lea.vmem %s46_s20, 64  ;;  %p2564_p8 = scmp.lt.s32.totalorder %s46_s20, %s46_s20 }
  0x4e   :  { %p2560_p7 = scmp.ne.s32.totalorder %s46_s20, %s2559_s15  ;;  %p2565_p9 = scmp.lt.s32.totalorder %s2559_s15, %s2559_s15 }
  0x50   :  { %p2566_p10 = por %p2565_p9, %p2564_p8 }
  0x52   :  { %p2567_p11 = pnand %p2566_p10, %p2560_p7 }
  0x54   :  { %2570 = shalt.err (!%p2567_p11)
}
  0x55   :  { %48 = dma.hbm_to_vmem [thread:$0]  %s3004_s2, 64, %s46_s20, [#allocation6]  }
  0x56   :  { %s2656_s18 = smov [#allocation10]   ;;  %s2657_s21 = smov [#allocation13]  }
  0x57   :  { %s66_s19 = sshll.u32 %s2656_s18, 4  ;;  %s90_s22 = sshll.u32 %s2657_s21, 4  ;;  %s67_s19 = int_to_ptr.vmem [resolvable:$true] %s66_s19  ;;  %s91_s22 = int_to_ptr.vmem [resolvable:$true] %s90_s22 }
  0x58   :  { %s2571_s26 = scalar_lea.hbm %s3006_s4, 640 }
  0x59   :  { %p2572_p12 = scmp.ne.s32.totalorder %s3006_s4, %s2571_s26  ;;  %p2575_p13 = scmp.lt.u32.totalorder %s2571_s26, %s3006_s4 }
  0x5b   :  { %p2577_p0 = pnand %p2575_p13, %p2572_p12 }
  0x5d   :  { %2580 = shalt.err (!%p2577_p0)
}
  0x5e   :  { %s2581_s2 = scalar_lea.vmem %s67_s19, 640  ;;  %p2586_p2 = scmp.lt.s32.totalorder %s67_s19, %s67_s19 }
  0x5f   :  { %p2582_p1 = scmp.ne.s32.totalorder %s67_s19, %s2581_s2  ;;  %p2587_p3 = scmp.lt.s32.totalorder %s2581_s2, %s2581_s2 }
  0x61   :  { %p2588_p4 = por %p2587_p3, %p2586_p2 }
  0x63   :  { %p2589_p5 = pnand %p2588_p4, %p2582_p1 }
  0x65   :  { %2592 = shalt.err (!%p2589_p5)
}
  0x66   :  { %72 = dma.hbm_to_vmem [thread:$0]  %s3006_s4, 640, %s67_s19, [#allocation9], %s2650_s24, %s2650_s24, %s2651_s25  }
  0x67   :  { %s2593_s9 = scalar_lea.hbm %s3008_s6, 256 }
  0x68   :  { %p2594_p6 = scmp.ne.s32.totalorder %s3008_s6, %s2593_s9  ;;  %p2597_p7 = scmp.lt.u32.totalorder %s2593_s9, %s3008_s6 }
  0x6a   :  { %p2599_p8 = pnand %p2597_p7, %p2594_p6 }
  0x6c   :  { %2602 = shalt.err (!%p2599_p8)
}
  0x6d   :  { %s2603_s15 = scalar_lea.vmem %s91_s22, 256  ;;  %p2608_p10 = scmp.lt.s32.totalorder %s91_s22, %s91_s22 }
  0x6e   :  { %p2604_p9 = scmp.ne.s32.totalorder %s91_s22, %s2603_s15  ;;  %p2609_p11 = scmp.lt.s32.totalorder %s2603_s15, %s2603_s15 }
  0x70   :  { %p2610_p12 = por %p2609_p11, %p2608_p10 }
  0x72   :  { %p2611_p13 = pnand %p2610_p12, %p2604_p9 }
  0x74   :  { %2614 = shalt.err (!%p2611_p13)
}
  0x75   :  { %96 = dma.hbm_to_vmem [thread:$0]  %s3008_s6, 256, %s91_s22, [#allocation12], %s2652_s3, %s2652_s3, %s2653_s13  }
  0x76   :  { %2637 = dma.done.wait [#allocation3], 128  }
  0x77   :  { %2638 = vsyncadd [#allocation3], 4294967168 }
  0x78   :  { %2639 = dma.done.wait [#allocation6], 128  }
  0x79   :  { %2640 = vsyncadd [#allocation6], 4294967168 }
  0x7a   :  { %2641 = dma.done.wait [#allocation9], 1280  }
  0x7b   :  { %2642 = vsyncadd [#allocation9], 4294966016 }
  0x7c   :  { %2643 = dma.done.wait [#allocation12], 512  }
  0x7d   :  { %2644 = vsyncadd [#allocation12], 4294966784  ;;  %v2806_v0 = vld [vmem:[#allocation2] sm:$0xf]  ;;  %v2808_v1 = vld [vmem:[#allocation2 + $0x4] sm:$0xf]  ;;  %v220_v12 = vlaneseq }
  0x7e   :  { %vm125_vm0 = vcmask 130048   ;;  %v120_v2 = vld [vmem:[#allocation11] sm:$0xff]  ;;  %v124_v3 = vcombine.low %v2806_v0, %v2808_v1  ;;  %v121_v4 = vld [vmem:[#allocation11 + $0x8] sm:$0x3]  ;;  %v2658_v5 = vmov 0.0   ;;  %vm316_vm1 = vcmask 1043456  }
  0x7f   :  { %2286 = vmatprep.mubr.msk.f32.mxu0 %vm125_vm0, %v120_v2  ;;  %2289 = vmatprep.subr.mxu1 %v2658_v5  ;;  %v302_v6 = vld [vmem:[#allocation10] sm:$0xf]  ;;  %v304_v7 = vld [vmem:[#allocation10 + $0x8] sm:$0xf]  ;;  %vm2659_vm2 = vmmov 0   ;;  %s2660_s6 = smov 124  }
  0x80   :  { %2284 = vmatprep.subr.msk.mxu0 %vm125_vm0, %v124_v3  ;;  %2290 = vmatpush3.msk.msra.mxu1 %vm316_vm1, %v302_v6  ;;  %v2661_v10 = vmov 1983009808   ;;  %v221_v14 = vshrl.u32 %v220_v12, 7  ;;  %v2662_v15 = vmov 1934713408   ;;  %vm312_vm3 = vcmask 31744  }
  0x81   :  { %2285 = vmatpush3.xpose.msk.msra.mxu0 %vm125_vm0, %v124_v3  ;;  %2291 = vmatprep.mubr.msk.f32.mxu1 %vm2659_vm2, %v2658_v5  ;;  %v218_v11 = vunpack.c.l.s4 %v2661_v10  ;;  %v249_v16 = vunpack.c.l.s4 %v2662_v15  ;;  %v303_v31 = vld [vmem:[#allocation10 + $0x4] sm:$0xf]  ;;  %v306_v33 = vld [vmem:[#allocation10 + $0x10] sm:$0xf]  ;;  %v305_v35 = vld [vmem:[#allocation10 + $0xc] sm:$0xf] }
  0x82   :  { %2299 = vmatprep.subr.mxu0 %v2658_v5  ;;  %2294 = vmatprep.subr.mxu1 %v2658_v5  ;;  %v308_v39 = vld [vmem:[#allocation10 + $0x18] sm:$0xf]  ;;  %v307_v41 = vld [vmem:[#allocation10 + $0x14] sm:$0xf]  ;;  %v310_v44 = vld [vmem:[#allocation10 + $0x20] sm:$0xf] }
  0x83   :  { %v219_v13 = vunpack.c.0.s8 %v218_v11  ;;  %v250_v18 = vunpack.c.0.s8 %v249_v16  ;;  %v309_v46 = vld [vmem:[#allocation10 + $0x1c] sm:$0xf]  ;;  %v311_v50 = vld [vmem:[#allocation10 + $0x24] sm:$0xf]  ;;  %v292_v53 = vld [vmem:[#allocation8] sm:$0xf] }
  0x84   :  { %2287 = vmatmul.mubr.msk.f32.vlgmr.msra.gmra.mrb[0].mxu0 %vm125_vm0, %v121_v4  ;;  %v293_v48 = vld [vmem:[#allocation8 + $0x4] sm:$0xf]  ;;  %v295_v51 = vld [vmem:[#allocation8 + $0xc] sm:$0xf]  ;;  %v299_v54 = vld [vmem:[#allocation8 + $0x1c] sm:$0xf] }
  0x85   :  { %2300 = vmatpush3.msk.msra.mxu0 %vm316_vm1, %v304_v7  ;;  %2301 = vmatprep.mubr.msk.f32.mxu0 %vm2659_vm2, %v2658_v5  ;;  %v2825_v17 = vsub.s32 %v219_v13, %v221_v14  ;;  %v2829_v22 = vsub.s32 %v250_v18, %v221_v14  ;;  %v294_v55 = vld [vmem:[#allocation8 + $0x8] sm:$0xf]  ;;  %v301_v56 = vld [vmem:[#allocation8 + $0x24] sm:$0xf]  ;;  %v296_v57 = vld [vmem:[#allocation8 + $0x10] sm:$0xf] }
  0x86   :  { %2309 = vmatprep.subr.mxu0 %v2658_v5  ;;  %v297_v58 = vld [vmem:[#allocation8 + $0x14] sm:$0xf]  ;;  %v298_v59 = vld [vmem:[#allocation8 + $0x18] sm:$0xf]  ;;  %v300_v60 = vld [vmem:[#allocation8 + $0x20] sm:$0xf] }
  0x87   :  { %vm1911_vm4 = vcmask 1041408   ;;  %vm2664_vm5 = vmmov 1   ;;  %vm1907_vm7 = vcmask 80896   ;;  %vm2160_vm8 = vcmask 125952   ;;  %s2666_s3 = smov [#allocation14]  }
  0x88   :  { %vm2408_vm6 = vmpackc.low %vm1911_vm4, %vm2664_vm5  ;;  %s2168_s13 = sshll.u32 %s2666_s3, 4  ;;  %s2169_s13 = int_to_ptr.vmem [resolvable:$true] %s2168_s13 }
  0x89   :  { %s2615_s17 = scalar_lea.vmem %s2169_s13, 128  ;;  %p2620_p1 = scmp.lt.s32.totalorder %s2169_s13, %s2169_s13 }
  0x8a   :  { %p2616_p0 = scmp.ne.s32.totalorder %s2169_s13, %s2615_s17  ;;  %p2621_p2 = scmp.lt.s32.totalorder %s2615_s17, %s2615_s17 }
  0x8c   :  { %p2622_p3 = por %p2621_p2, %p2620_p1 }
  0x8e   :  { %p2623_p4 = pnand %p2622_p3, %p2616_p0 }
 0x157   :  { %v2822_v8 = vpop.f32.mrb[0].mxu0 }
 0x158   :  { %v200_v9 = vpop.f32.mrb[1].mxu0 }
 0x159   :  { %211 = vrot.lane.b32.xlu0 %v200_v9, %s2660_s6  ;;  %v216_v19 = vcombine.high %v200_v9, %v2658_v5  ;;  %v223_v21 = vrot.slane %v200_v9, %v2825_v17 }
 0x15b   :  { %v230_v28 = vrot.slane %v216_v19, %v2825_v17 }
 0x15d   :  { %213 = vrot.lane.b32.xlu0 %v2822_v8, %s2660_s6 }
 0x1cb   :  { %v212_v20 = vpop.permute.xlu0 %211 }
 0x1cc   :  { %v231_v23 = vcombine.high %v212_v20, %v2658_v5  ;;  %v238_v24 = vrot.slane %v212_v20, %v2825_v17 }
 0x1ce   :  { %v245_v25 = vrot.slane %v231_v23, %v2825_v17  ;;  %v246_v26 = vcombine.low %v223_v21, %v238_v24  ;;  %v247_v27 = vcombine.high %v223_v21, %v238_v24 }
 0x1cf   :  { %v214_v38 = vpop.permute.xlu0 %213 }
 0x1d0   :  { %v2836_v29 = vrot.slane %v246_v26, %v2829_v22  ;;  %v2839_v30 = vrot.slane %v247_v27, %v2829_v22  ;;  %v262_v32 = vcombine.low %v230_v28, %v245_v25  ;;  %v263_v36 = vcombine.high %v230_v28, %v245_v25 }
 0x1d1   :  { %v283_v43 = vcombine.low %v2822_v8, %v214_v38 }
 0x1d2   :  { %2292 = vmatmul.mubr.msk.f32.vlgmr.msra.gmra.mrb[0].mxu1 %vm312_vm3, %v2836_v29  ;;  %2302 = vmatmul.mubr.msk.f32.vlgmr.msra.gmra.mrb[2].mxu0 %vm312_vm3, %v2839_v30  ;;  %v278_v34 = vcombine.high %v2836_v29, %v2658_v5  ;;  %v2852_v37 = vrot.slane %v262_v32, %v2829_v22  ;;  %v279_v40 = vcombine.high %v2839_v30, %v2658_v5  ;;  %v2663_v32 = vmov 0.0|0.0  }
 0x1d3   :  { %2295 = vmatpush3.msk.msra.mxu1 %vm316_vm1, %v303_v31  ;;  %2296 = vmatprep.mubr.msk.f32.mxu1 %vm2659_vm2, %v2658_v5  ;;  %v2868_v42 = vrot.slane %v263_v36, %v2829_v22  ;;  %v2885_v47 = vrot.slane %v283_v43, %v2829_v22 }
 0x1d4   :  { %2304 = vmatprep.subr.mxu1 %v2658_v5  ;;  %2310 = vmatpush3.msk.msra.mxu0 %vm316_vm1, %v306_v33  ;;  %v280_v45 = vcombine.high %v2852_v37, %v2658_v5 }
 0x1d5   :  { %2311 = vmatprep.mubr.msk.f32.mxu0 %vm2659_vm2, %v2658_v5  ;;  %2319 = vmatprep.subr.mxu0 %v2658_v5  ;;  %v281_v49 = vcombine.high %v2868_v42, %v2658_v5  ;;  %v291_v52 = vcombine.high %v2885_v47, %v2658_v5 }
 0x1d6   :  { %2297 = vmatmul.mubr.msk.f32.vlgmr.msra.gmra.mrb[2].mxu1 %vm312_vm3, %v278_v34  ;;  %2312 = vmatmul.mubr.msk.f32.vlgmr.msra.gmra.mrb[4].mxu0 %vm312_vm3, %v2852_v37 }
 0x1d7   :  { %2305 = vmatpush3.msk.msra.mxu1 %vm316_vm1, %v305_v35  ;;  %2306 = vmatprep.mubr.msk.f32.mxu1 %vm2659_vm2, %v2658_v5 }
 0x1d8   :  { %2314 = vmatprep.subr.mxu1 %v2658_v5  ;;  %2320 = vmatpush3.msk.msra.mxu0 %vm316_vm1, %v308_v39 }
 0x1d9   :  { %2321 = vmatprep.mubr.msk.f32.mxu0 %vm2659_vm2, %v2658_v5  ;;  %2329 = vmatprep.subr.mxu0 %v2658_v5 }
 0x1da   :  { %2307 = vmatmul.mubr.msk.f32.vlgmr.msra.gmra.mrb[4].mxu1 %vm312_vm3, %v279_v40  ;;  %2322 = vmatmul.mubr.msk.f32.vlgmr.msra.gmra.mrb[6].mxu0 %vm312_vm3, %v2868_v42 }
 0x1db   :  { %2315 = vmatpush3.msk.msra.mxu1 %vm316_vm1, %v307_v41  ;;  %2316 = vmatprep.mubr.msk.f32.mxu1 %vm2659_vm2, %v2658_v5 }
 0x1dc   :  { %2324 = vmatprep.subr.mxu1 %v2658_v5  ;;  %2330 = vmatpush3.msk.msra.mxu0 %vm316_vm1, %v310_v44 }
 0x1dd   :  { %2331 = vmatprep.mubr.msk.f32.mxu0 %vm2659_vm2, %v2658_v5  ;;  %2344 = vmatprep.subr.mxu0 %v2658_v5 }
 0x1de   :  { %2317 = vmatmul.mubr.msk.f32.vlgmr.msra.gmra.mrb[6].mxu1 %vm312_vm3, %v280_v45  ;;  %2332 = vmatmul.mubr.msk.f32.vlgmr.msra.gmra.mrb[8].mxu0 %vm312_vm3, %v2885_v47 }
 0x1df   :  { %2325 = vmatpush3.msk.msra.mxu1 %vm316_vm1, %v309_v46  ;;  %2326 = vmatprep.mubr.msk.f32.mxu1 %vm2659_vm2, %v2658_v5  ;;  %v2136_v46 = vld [vmem:[#allocation7] sm:$0xf] }
 0x1e0   :  { %2334 = vmatprep.subr.mxu1 %v2658_v5  ;;  %2345 = vmatpush3.msk.msra.mxu0 %vm316_vm1, %v293_v48  ;;  %v1988_v48 = vld [vmem:[#allocation5] sm:$0xf] }
 0x1e1   :  { %2346 = vmatprep.mubr.msk.f32.mxu0 %vm2659_vm2, %v2658_v5  ;;  %2354 = vmatprep.subr.mxu0 %v2658_v5 }
 0x1e2   :  { %2327 = vmatmul.mubr.msk.f32.vlgmr.msra.gmra.mrb[8].mxu1 %vm312_vm3, %v281_v49  ;;  %2347 = vmatmul.mubr.msk.f32.vlgmr.msra.gmra.mrb[6].mxu0 %vm312_vm3, %v278_v34 }
 0x1e3   :  { %2335 = vmatpush3.msk.msra.mxu1 %vm316_vm1, %v311_v50  ;;  %2336 = vmatprep.mubr.msk.f32.mxu1 %vm2659_vm2, %v2658_v5 }
 0x1e4   :  { %2339 = vmatprep.subr.mxu1 %v2658_v5  ;;  %2355 = vmatpush3.msk.msra.mxu0 %vm316_vm1, %v295_v51 }
 0x1e5   :  { %2356 = vmatprep.mubr.msk.f32.mxu0 %vm2659_vm2, %v2658_v5  ;;  %2374 = vmatprep.subr.mxu0 %v2658_v5 }
 0x1e6   :  { %2337 = vmatmul.mubr.msk.f32.vlgmr.msra.gmra.mrb[10].mxu1 %vm312_vm3, %v291_v52  ;;  %2357 = vmatmul.mubr.msk.f32.vlgmr.msra.gmra.mrb[8].mxu0 %vm312_vm3, %v279_v40 }
 0x1e7   :  { %2340 = vmatpush3.msk.msra.mxu1 %vm316_vm1, %v292_v53  ;;  %2341 = vmatprep.mubr.msk.f32.mxu1 %vm2659_vm2, %v2658_v5 }
 0x1e8   :  { %2349 = vmatprep.subr.mxu1 %v2658_v5  ;;  %2375 = vmatpush3.msk.msra.mxu0 %vm316_vm1, %v299_v54 }
 0x1e9   :  { %2376 = vmatprep.mubr.msk.f32.mxu0 %vm2659_vm2, %v2658_v5  ;;  %2384 = vmatprep.subr.mxu0 %v2658_v5 }
 0x1ea   :  { %2342 = vmatmul.mubr.msk.f32.vlgmr.msra.gmra.mrb[6].mxu1 %vm312_vm3, %v2836_v29  ;;  %2377 = vmatmul.mubr.msk.f32.vlgmr.msra.gmra.mrb[2].mxu0 %vm312_vm3, %v281_v49  ;;  %v1873_v29 = vld [vmem:[#allocation13] sm:$0xff] }
 0x1eb   :  { %2350 = vmatpush3.msk.msra.mxu1 %vm316_vm1, %v294_v55  ;;  %2351 = vmatprep.mubr.msk.f32.mxu1 %vm2659_vm2, %v2658_v5 }
 0x1ec   :  { %2359 = vmatprep.subr.mxu1 %v2658_v5  ;;  %2385 = vmatpush3.msk.msra.mxu0 %vm316_vm1, %v301_v56 }
 0x1ed   :  { %2386 = vmatprep.mubr.msk.f32.mxu0 %vm2659_vm2, %v2658_v5  ;;  %2406 = vmatprep.subr.bf16.mxu0 %v2663_v32 }
 0x1ee   :  { %2352 = vmatmul.mubr.msk.f32.vlgmr.msra.gmra.mrb[8].mxu1 %vm312_vm3, %v2839_v30  ;;  %2387 = vmatmul.mubr.msk.f32.vlgmr.msra.gmra.mrb[4].mxu0 %vm312_vm3, %v291_v52  ;;  %v1874_v30 = vld [vmem:[#allocation13 + $0x8] sm:$0x3] }
 0x1ef   :  { %2360 = vmatpush3.msk.msra.mxu1 %vm316_vm1, %v296_v57  ;;  %2361 = vmatprep.mubr.msk.f32.mxu1 %vm2659_vm2, %v2658_v5  ;;  %v2407_v33 = vpack.c.bf16 %v1874_v30, %v1873_v29 }
 0x1f0   :  { %2364 = vmatprep.subr.mxu1 %v2658_v5  ;;  %2393 = vmatprep.mubr.msk.f32.mxu0 %vm2659_vm2, %v2658_v5 }
 0x1f1   :  { %2409 = vmatpush3.bf16.msk.msra.mxu0 %vm2408_vm6, %v2407_v33 }
 0x1f2   :  { %2362 = vmatmul.mubr.msk.f32.vlgmr.msra.gmra.mrb[10].mxu1 %vm312_vm3, %v2852_v37  ;;  %2396 = vmatprep.subr.mxu0 %v2658_v5 }
 0x1f3   :  { %2365 = vmatpush3.msk.msra.mxu1 %vm316_vm1, %v297_v58  ;;  %2366 = vmatprep.mubr.msk.f32.mxu1 %vm2659_vm2, %v2658_v5 }
 0x1f4   :  { %2369 = vmatprep.subr.mxu1 %v2658_v5 }
 0x1f6   :  { %2367 = vmatmul.mubr.msk.f32.vlgmr.msra.gmra.mrb[0].mxu1 %vm312_vm3, %v280_v45 }
 0x1f7   :  { %2370 = vmatpush3.msk.msra.mxu1 %vm316_vm1, %v298_v59  ;;  %2371 = vmatprep.mubr.msk.f32.mxu1 %vm2659_vm2, %v2658_v5 }
 0x1f8   :  { %2379 = vmatprep.subr.mxu1 %v2658_v5 }
 0x1fa   :  { %2372 = vmatmul.mubr.msk.f32.vlgmr.msra.gmra.mrb[2].mxu1 %vm312_vm3, %v2868_v42 }
 0x1fb   :  { %2380 = vmatpush3.msk.msra.mxu1 %vm316_vm1, %v300_v60  ;;  %2381 = vmatprep.mubr.msk.f32.mxu1 %vm2659_vm2, %v2658_v5 }
 0x1fe   :  { %2382 = vmatmul.mubr.msk.f32.vlgmr.msra.gmra.mrb[4].mxu1 %vm312_vm3, %v2885_v47  ;;  %v2665_v47 = vmov 0  }
 0x1ff   :  { %2450 = vset.pattern.permute.xlu1 %v2665_v47 }
 0x2b5   :  { %v1216_v61 = vpop.f32.mrb[6].mxu0 }
 0x2b6   :  { %v2348_v62 = vpop.f32.mrb[7].mxu0 }
 0x2b9   :  { %v1362_v63 = vpop.f32.mrb[8].mxu0 }
 0x2ba   :  { %v1812_v2 = vcombine.low %v1216_v61, %v1362_v63  ;;  %v2358_v3 = vpop.f32.mrb[9].mxu0 }
 0x2bc   :  { %v1819_v14 = vrot.slane %v1812_v2, %v2825_v17 }
 0x2bd   :  { %v1143_v4 = vpop.f32.mrb[6].mxu1  ;;  %v1654_v6 = vpop.f32.mrb[2].mxu0 }
 0x2be   :  { %v2343_v7 = vpop.f32.mrb[7].mxu1  ;;  %v2378_v8 = vpop.f32.mrb[3].mxu0 }
 0x2c1   :  { %v1289_v9 = vpop.f32.mrb[8].mxu1  ;;  %v1800_v11 = vpop.f32.mrb[4].mxu0 }
 0x2c2   :  { %v1804_v10 = vcombine.low %v1143_v4, %v1289_v9  ;;  %v2353_v12 = vpop.f32.mrb[9].mxu1  ;;  %v2388_v13 = vpop.f32.mrb[5].mxu0 }
 0x2c4   :  { %v1811_v15 = vrot.slane %v1804_v10, %v2825_v17 }
 0x2c5   :  { %v1435_v16 = vpop.f32.mrb[10].mxu1 }
 0x2c6   :  { %v2363_v18 = vpop.f32.mrb[11].mxu1  ;;  %v1836_v19 = vcombine.low %v1811_v15, %v1819_v14 }
 0x2c8   :  { %v1843_v37 = vrot.slane %v1836_v19, %v2829_v22 }
 0x2c9   :  { %v1508_v20 = vpop.f32.mrb[0].mxu1 }
 0x2ca   :  { %v1828_v21 = vcombine.low %v1508_v20, %v1654_v6  ;;  %v2368_v23 = vpop.f32.mrb[1].mxu1 }
 0x2cc   :  { %v1835_v27 = vrot.slane %v1828_v21, %v2825_v17 }
 0x2cd   :  { %v1581_v24 = vpop.f32.mrb[2].mxu1 }
 0x2ce   :  { %v1820_v25 = vcombine.low %v1435_v16, %v1581_v24  ;;  %v2373_v26 = vpop.f32.mrb[3].mxu1 }
 0x2d0   :  { %v1827_v28 = vrot.slane %v1820_v25, %v2825_v17 }
 0x2d1   :  { %v1727_v31 = vpop.f32.mrb[4].mxu1 }
 0x2d2   :  { %v1854_v34 = vcombine.low %v1727_v31, %v1800_v11  ;;  %v2383_v35 = vpop.f32.mrb[5].mxu1  ;;  %v1844_v36 = vcombine.low %v1827_v28, %v1835_v27 }
 0x2d4   :  { %v1851_v38 = vrot.slane %v1844_v36, %v2829_v22  ;;  %v1861_v17 = vrot.slane %v1854_v34, %v2829_v22 }
 0x2d6   :  { %v1853_v39 = vcombine.high %v1843_v37, %v1851_v38  ;;  %v1852_v40 = vcombine.low %v1843_v37, %v1851_v38  ;;  %v1862_v41 = vcombine.high %v1861_v17, %v2658_v5 }
 0x2d8   :  { %1865 = vrot.lane.b32.xlu1 %v1853_v39, %s2651_s25 }
 0x2dc   :  { %1867 = vrot.lane.b32.xlu1 %v1862_v41, %s2651_s25 }
 0x2e0   :  { %2141 = vperm.xlu1 %2450, %v2136_v46  }
 0x34a   :  { %v1866_v42 = vpop.permute.xlu1 %1865 }
 0x34b   :  { %v1871_v43 = vsel %vm312_vm3, %v1852_v40, %v1866_v42 }
 0x34c   :  { %1875 = vxpose.xlu0.b32.start [1/2] (short) (narrow) %v1871_v43, 8 }
 0x34e   :  { %v1868_v44 = vpop.permute.xlu1 %1867 }
 0x34f   :  { %v1872_v45 = vsel %vm312_vm3, %v1861_v17, %v1868_v44 }
 0x350   :  { %1876 = vxpose.xlu0.b32.end [2/2] (short) (narrow) %v1872_v45, 8 }
 0x379   :  { %2451 = vset.pattern.permute.xlu0 %v2665_v47 }
 0x3cc   :  { %v1891_v22 = vpop.trf.xlu0 }
 0x3cd   :  { %2394 = vmatmul.mubr.msk.f32.vlgmr.msra.gmra.mrb[10].mxu0 %vm1907_vm7, %v1891_v22 }
 0x3ce   :  { %2397 = vmatpush3.msk.msra.mxu0 %vm316_vm1, %v2806_v0  ;;  %2398 = vmatprep.mubr.msk.f32.mxu0 %vm2659_vm2, %v2658_v5  ;;  %v2142_v0 = vpop.permute.xlu1 %2141 }
 0x3cf   :  { %2401 = vmatprep.subr.mxu0 %v2658_v5 }
 0x3d1   :  { %2399 = vmatmul.mubr.msk.f32.vlgmr.msra.gmra.mrb[12].mxu0 %vm312_vm3, %v1988_v48 }
 0x3d2   :  { %2402 = vmatpush3.msk.msra.mxu0 %vm316_vm1, %v2808_v1  ;;  %2403 = vmatprep.mubr.msk.f32.mxu0 %vm2659_vm2, %v2658_v5 }
 0x3d5   :  { %2404 = vmatmul.mubr.msk.f32.vlgmr.msra.gmra.mrb[14].mxu0 %vm312_vm3, %v1988_v48 }
 0x4a0   :  { %v1981_v49 = vpop.f32.mrb[10].mxu0 }
 0x4a1   :  { %v2395_v50 = vpop.f32.mrb[11].mxu0  ;;  %v1986_v54 = vcombine.high %v1981_v49, %v1981_v49 }
 0x4a4   :  { %v2060_v51 = vpop.f32.mrb[12].mxu0 }
 0x4a5   :  { %v2137_v52 = vadd.f32 %v2060_v51, %v1981_v49  ;;  %v2400_v53 = vpop.f32.mrb[13].mxu0 }
 0x4a7   :  { %v2144_v55 = vadd.f32 %v2142_v0, %v2137_v52 }
 0x4a8   :  { %v2132_v56 = vpop.f32.mrb[14].mxu0 }
 0x4a9   :  { %v2232_v57 = vmul.f32 -1.442695, %v2144_v55  ;;  %v2138_v58 = vadd.f32 %v2132_v56, %v1986_v54  ;;  %v2405_v59 = vpop.f32.mrb[15].mxu0 }
 0x4ab   :  { %2453 = vpow2.f32 %v2232_v57  ;;  %v2145_v60 = vadd.f32 %v2142_v0, %v2138_v58 }
 0x4ad   :  { %v2233_v1 = vmul.f32 -1.442695, %v2145_v60 }
 0x4af   :  { %2455 = vpow2.f32 %v2233_v1 }
 0x4b5   :  { %v2454_v61 = vpop.eup %2453 }
 0x4b6   :  { %v2152_v5 = vadd.f32 1.0, %v2454_v61 }
 0x4b8   :  { %2457 = vrcp.f32 %v2152_v5 }
 0x4b9   :  { %v2456_v62 = vpop.eup %2455 }
 0x4ba   :  { %v2153_v63 = vadd.f32 1.0, %v2456_v62 }
 0x4bc   :  { %2459 = vrcp.f32 %v2153_v63 }
 0x4c2   :  { %v2458_v2 = vpop.eup %2457 }
 0x4c3   :  { %v2158_v3 = vmul.f32 %v2458_v2, %v2144_v55 }
 0x4c5   :  { %2161 = vst.msk [vmem:[#allocation14] sm:$0xf] %vm2160_vm8, %v2158_v3 }
 0x4c6   :  { %v2460_v4 = vpop.eup %2459 }
 0x4c7   :  { %v2159_v6 = vmul.f32 %v2460_v4, %v2145_v60 }
 0x4c9   :  { %2162 = vst.msk [vmem:[#allocation14 + $0x4] sm:$0xf] %vm2160_vm8, %v2159_v6 }
 0x4ca   :  { %2626 = shalt.err (!%p2623_p4)
}
 0x4cb   :  { %s2627_s21 = scalar_lea.hbm %s3009_s7, 128 }
 0x4cc   :  { %p2628_p5 = scmp.ne.s32.totalorder %s3009_s7, %s2627_s21  ;;  %p2631_p6 = scmp.lt.u32.totalorder %s2627_s21, %s3009_s7 }
 0x4ce   :  { %p2633_p7 = pnand %p2631_p6, %p2628_p5 }
 0x4d0   :  { %2636 = shalt.err (!%p2633_p7)
}
 0x4d1   :  { %2174 = dma.vmem_to_hbm [thread:$0]  %s2169_s13, 128, %s3009_s7, [#allocation4], %s2650_s24, %s2650_s24, %s2651_s25  }
 0x4d2   :  { %2645 = dma.done.wait [#allocation4], 128  }
 0x4d3   :  { %2646 = vsyncadd [#allocation4], 4294967168 }
 0x4d4   :  { %2178 = vsyncpa [#allocation3], 1 }
 0x4d5   :  { %2179 = vsyncpa [#allocation6], 1 }
 0x4d6   :  { %2180 = vsyncpa [#allocation9], 1 }
 0x4d7   :  { %2181 = vsyncpa [#allocation12], 1 }
 0x4d8   :  { %2182 = vsyncpa [#allocation4], 1 }

</bundles_post_ra>
